<compile_context>
chip_gen: v7x
topology: tpu7x:2x2x1
jax: 0.10.0
libtpu: 0.0.40
codegen_flags: <defaults>
</compile_context>

<pallas_src>
import math

import jax
import jax.numpy as jnp
from jax.experimental import pallas as pl
from jax.experimental.pallas import tpu as pltpu


_LN_EPS = 1e-5
_NEG_INF = -1e30          # finite "minus infinity" additive mask bias
_VMEM_LIMIT = 32 * 1024 * 1024   # explicit budget; safe on v5e/v6e/v7x


# ----------------------------- shared helpers ------------------------------

def _layer_norm(x, w, b):
    mean = jnp.mean(x, axis=-1, keepdims=True)
    xc = x - mean
    var = jnp.mean(xc * xc, axis=-1, keepdims=True)   # biased, like F.layer_norm
    return xc * jax.lax.rsqrt(var + _LN_EPS) * w + b


# ----------------------------- Pallas kernels ------------------------------

def attn_head_kernel(x_ref, ln1w_ref, ln1b_ref,
                     wq_ref, wk_ref, wv_ref, bq_ref, bk_ref, bv_ref,
                     er_ref, maskb_ref, o_ref, ln_ref):
    """One (batch, head) grid step: ln_1 + per-head q/k/v projection +
    relative global attention for that head.  Output is head-major (T, d)."""
    T, d = o_ref.shape
    scale = 1.0 / math.sqrt(d)

    # LayerNorm(x_b) once per batch element, shared by all its head steps.
    @pl.when(pl.program_id(1) == 0)
    def _():
        ln_ref[...] = _layer_norm(x_ref[...], ln1w_ref[...], ln1b_ref[...])

    lnx = ln_ref[...].astype(jnp.bfloat16)            # (T, C) -> MXU operand

    # Per-head projections: (T, C) @ (C, d) on the MXU, f32 accumulate + bias.
    q = jnp.dot(lnx, wq_ref[...], preferred_element_type=jnp.float32) + bq_ref[...]
    k = jnp.dot(lnx, wk_ref[...], preferred_element_type=jnp.float32) + bk_ref[...]
    v = jnp.dot(lnx, wv_ref[...], preferred_element_type=jnp.float32) + bv_ref[...]
    qb = q.astype(jnp.bfloat16)

    # QK^T on the MXU (contract the d axis of both operands; no transposes).
    qk = jax.lax.dot_general(
        qb, k.astype(jnp.bfloat16), (((1,), (1,)), ((), ())),
        preferred_element_type=jnp.float32)            # (T, T)

    # Srel: QEr on the MXU against the (W=128, d) left-padded Er table, then the
    # Music-Transformer skew as one strided roll (row r rolled right by r+1).
    #   rolled[r, c] = qer[r, (c - 1 - r) mod W]
    # which for c <= r reads Er[start + (c - r + T - 1)] exactly; c > r lands in
    # the zero padding (masked below anyway).
    qer = jax.lax.dot_general(
        qb, er_ref[...], (((1,), (1,)), ((), ())),
        preferred_element_type=jnp.float32)            # (T, W)
    srel = pltpu.roll(qer, shift=1, axis=1, stride=1, stride_axis=0)[:, :T]

    # Scale, additive mask bias (precomputed in the wrapper), stable softmax.
    att = (qk + srel) * scale + maskb_ref[...]
    att = att - jnp.max(att, axis=-1, keepdims=True)
    p = jnp.exp(att)
    p = p * pl.reciprocal(jnp.sum(p, axis=-1, keepdims=True), approx=True)

    # attention @ V, written straight into this head's output block.
    o_ref[...] = jnp.dot(p.astype(jnp.bfloat16), v.astype(jnp.bfloat16),
                         preferred_element_type=jnp.float32)


def merge_ln_mlp_kernel(x_ref, att_ref, ln2w_ref, ln2b_ref,
                        wfc_ref, bfc_ref, wpj_ref, bpj_ref, o_ref):
    """One batch element: merge head outputs + first residual, then
    ln_2 + c_fc + exact erf-GELU + c_proj + second residual."""
    H, T, d = att_ref.shape
    x = x_ref[...]                                     # (T, C) f32

    # Head merge + first residual (static lane slices, done once per step).
    parts = [x[:, h * d:(h + 1) * d] + att_ref[h] for h in range(H)]
    x1 = jnp.concatenate(parts, axis=-1)               # (T, C)

    h2 = _layer_norm(x1, ln2w_ref[...], ln2b_ref[...])
    m = (jnp.dot(h2.astype(jnp.bfloat16), wfc_ref[...],
                 preferred_element_type=jnp.float32) + bfc_ref[...])
    # exact (erf) GELU — matches torch.nn.GELU() default
    m = 0.5 * m * (1.0 + jax.lax.erf(m * (1.0 / math.sqrt(2.0))))
    y = (jnp.dot(m.astype(jnp.bfloat16), wpj_ref[...],
                 preferred_element_type=jnp.float32) + bpj_ref[...])
    o_ref[...] = x1 + y                                 # dropout = identity


# ------------------------------ wrappers -----------------------------------

def rel_attention_heads(x, ln1_w, ln1_b, wq, wk, wv, bq, bk, bv,
                        er_pad, mask_bias):
    B, T, C = x.shape
    H, _, d = wq.shape
    W = er_pad.shape[0]
    return pl.pallas_call(
        attn_head_kernel,
        out_shape=jax.ShapeDtypeStruct((B, H, T, d), jnp.float32),
        grid=(B, H),
        in_specs=[
            pl.BlockSpec((None, T, C), lambda b, h: (b, 0, 0)),    # x
            pl.BlockSpec((1, C), lambda b, h: (0, 0)),             # ln1_w
            pl.BlockSpec((1, C), lambda b, h: (0, 0)),             # ln1_b
            pl.BlockSpec((None, C, d), lambda b, h: (h, 0, 0)),    # wq (bf16)
            pl.BlockSpec((None, C, d), lambda b, h: (h, 0, 0)),    # wk (bf16)
            pl.BlockSpec((None, C, d), lambda b, h: (h, 0, 0)),    # wv (bf16)
            pl.BlockSpec((None, 1, d), lambda b, h: (h, 0, 0)),    # bq
            pl.BlockSpec((None, 1, d), lambda b, h: (h, 0, 0)),    # bk
            pl.BlockSpec((None, 1, d), lambda b, h: (h, 0, 0)),    # bv
            pl.BlockSpec((W, d), lambda b, h: (0, 0)),             # Er (padded, bf16)
            pl.BlockSpec((T, T), lambda b, h: (0, 0)),             # additive mask bias
        ],
        out_specs=pl.BlockSpec((None, None, T, d), lambda b, h: (b, h, 0, 0)),
        scratch_shapes=[pltpu.VMEM((T, C), jnp.float32)],          # ln_1(x_b)
        compiler_params=pltpu.CompilerParams(
            dimension_semantics=("parallel", "arbitrary"),
            vmem_limit_bytes=_VMEM_LIMIT),
    )(x, ln1_w, ln1_b, wq, wk, wv, bq, bk, bv, er_pad, mask_bias)


def merge_ln_mlp(x, att, ln2_w, ln2_b, w_fc, b_fc, w_proj, b_proj):
    B, T, C = x.shape
    H, d = att.shape[1], att.shape[3]
    Hd = w_fc.shape[1]
    return pl.pallas_call(
        merge_ln_mlp_kernel,
        out_shape=jax.ShapeDtypeStruct((B, T, C), jnp.float32),
        grid=(B,),
        in_specs=[
            pl.BlockSpec((None, T, C), lambda b: (b, 0, 0)),       # x
            pl.BlockSpec((None, H, T, d), lambda b: (b, 0, 0, 0)), # head outputs
            pl.BlockSpec((1, C), lambda b: (0, 0)),                # ln2_w
            pl.BlockSpec((1, C), lambda b: (0, 0)),                # ln2_b
            pl.BlockSpec((C, Hd), lambda b: (0, 0)),               # w_fc (bf16)
            pl.BlockSpec((1, Hd), lambda b: (0, 0)),               # b_fc
            pl.BlockSpec((Hd, C), lambda b: (0, 0)),               # w_proj (bf16)
            pl.BlockSpec((1, C), lambda b: (0, 0)),                # b_proj
        ],
        out_specs=pl.BlockSpec((None, T, C), lambda b: (b, 0, 0)),
        compiler_params=pltpu.CompilerParams(
            dimension_semantics=("parallel",),
            vmem_limit_bytes=_VMEM_LIMIT),
    )(x, att, ln2_w, ln2_b, w_fc, b_fc, w_proj, b_proj)


# --------------------------- full Block forward -----------------------------

def block_forward(x, params, attn_mask, *, n_head, max_seq):
    B, T, C = x.shape
    assert C % n_head == 0 and T <= max_seq
    d = C // n_head

    # Head-major per-head weights (n_head, C, d) in bf16 (MXU dtype, half DMA);
    # biases (n_head, 1, d) stay f32.
    def w_heads(w):
        return jnp.transpose(w.reshape(C, n_head, d), (1, 0, 2)).astype(jnp.bfloat16)

    def b_heads(b):
        return b.reshape(n_head, 1, d).astype(jnp.float32)

    wq_h, wk_h, wv_h = w_heads(params["wq"]), w_heads(params["wk"]), w_heads(params["wv"])
    bq_h, bk_h, bv_h = b_heads(params["bq"]), b_heads(params["bk"]), b_heads(params["bv"])

    # Er left-padded to a lane-aligned width W (multiple of 128): the valid T
    # rows sit at [W-T, W) so the in-kernel strided roll uses amounts 1..T.
    W = ((T + 127) // 128) * 128
    start = max_seq - T
    er_pad = jnp.zeros((W, d), jnp.float32).at[W - T:].set(
        params["Er"][start:start + T]).astype(jnp.bfloat16)

    # Additive mask bias, computed once here (not per head inside the kernel).
    mask_bias = jnp.where(attn_mask == 0, _NEG_INF, 0.0).astype(jnp.float32)

    # Kernel 1: ln_1 + q/k/v projection + relative attention, grid (B, n_head).
    att = rel_attention_heads(x, params["ln1_w"], params["ln1_b"],
                              wq_h, wk_h, wv_h, bq_h, bk_h, bv_h,
                              er_pad, mask_bias)                    # (B, H, T, d)

    # Kernel 2: head merge + residual + ln_2 + MLP + residual, grid (B,).
    return merge_ln_mlp(x, att, params["ln2_w"], params["ln2_b"],
                        params["w_fc"].astype(jnp.bfloat16), params["b_fc"],
                        params["w_proj"].astype(jnp.bfloat16), params["b_proj"])


# ------------------------- pure-JAX reference -------------------------------

def block_forward_ref(x, params, attn_mask, *, n_head, max_seq):
    B, T, C = x.shape
    H, d = n_head, C // n_head

    def ln(z, w, b):
        m = jnp.mean(z, axis=-1, keepdims=True)
        v = jnp.mean((z - m) ** 2, axis=-1, keepdims=True)
        return (z - m) * jax.lax.rsqrt(v + _LN_EPS) * w.reshape(-1) + b.reshape(-1)

    h1 = ln(x, params["ln1_w"], params["ln1_b"])
    q = h1 @ params["wq"] + params["bq"]
    k = h1 @ params["wk"] + params["bk"]
    v = h1 @ params["wv"] + params["bv"]
    heads = lambda z: z.reshape(B, T, H, d).transpose(0, 2, 1, 3)
    q, k, v = heads(q), heads(k), heads(v)

    start = max_seq - T
    er_t = params["Er"][start:, :].T                                 # (d, T)
    qer = jnp.einsum("bhtd,dm->bhtm", q, er_t)
    padded = jnp.pad(qer, ((0, 0), (0, 0), (0, 0), (1, 0)))
    srel = padded.reshape(B, H, T + 1, T)[:, :, 1:, :]               # exact skew
    att = (jnp.einsum("bhtd,bhsd->bhts", q, k) + srel) / math.sqrt(d)
    att = jnp.where(attn_mask == 0, -jnp.inf, att)
    att = jax.nn.softmax(att, axis=-1)
    out = jnp.einsum("bhts,bhsd->bhtd", att, v)
    out = out.transpose(0, 2, 1, 3).reshape(B, T, C)
    x = x + out

    h2 = ln(x, params["ln2_w"], params["ln2_b"])
    m = h2 @ params["w_fc"] + params["b_fc"].reshape(-1)
    m = 0.5 * m * (1.0 + jax.lax.erf(m / math.sqrt(2.0)))
    m = m @ params["w_proj"] + params["b_proj"].reshape(-1)
    return x + m


# ------------------------------ param init ----------------------------------

def init_params(key, n_embd, n_head, max_seq, mlp_hidden):
    d_head = n_embd // n_head
    keys = jax.random.split(key, 6)

    def lin(k, fan_in, fan_out):
        kw, kb = jax.random.split(k)
        w = jax.random.normal(kw, (fan_in, fan_out), jnp.float32) * 0.02
        b = jax.random.normal(kb, (fan_out,), jnp.float32) * 0.02
        return w, b

    wq, bq = lin(keys[0], n_embd, n_embd)
    wk, bk = lin(keys[1], n_embd, n_embd)
    wv, bv = lin(keys[2], n_embd, n_embd)
    w_fc, b_fc = lin(keys[3], n_embd, mlp_hidden)
    w_proj, b_proj = lin(keys[4], mlp_hidden, n_embd)
    Er = jax.random.normal(keys[5], (max_seq, d_head), jnp.float32)

    return {
        "ln1_w": jnp.ones((1, n_embd), jnp.float32),
        "ln1_b": jnp.zeros((1, n_embd), jnp.float32),
        "ln2_w": jnp.ones((1, n_embd), jnp.float32),
        "ln2_b": jnp.zeros((1, n_embd), jnp.float32),
        "wq": wq, "bq": bq, "wk": wk, "bk": bk, "wv": wv, "bv": bv,
        "w_fc": w_fc, "b_fc": b_fc.reshape(1, -1),
        "w_proj": w_proj, "b_proj": b_proj.reshape(1, -1),
        "Er": Er,
    }


# --------------------------------- main --------------------------------------

if __name__ == "__main__":
    # config: n_embd=32, n_head=4 (d_head=8), max_seq=16, bias=True,
    #         MLP_width=None -> hidden=4*32=128, dropout=0.0 (eval)
    B, T, C = 2, 8, 32
    n_head = 4
    max_seq = 16
    mlp_hidden = 4 * C

    key = jax.random.PRNGKey(0)
    k_params, k_x = jax.random.split(key)
    params = init_params(k_params, C, n_head, max_seq, mlp_hidden)

    x = jax.random.normal(k_x, (B, T, C), jnp.float32)
    attn_mask = jnp.tril(jnp.ones((T, T), jnp.float32))   # causal mask

    out = block_forward(x, params, attn_mask, n_head=n_head, max_seq=max_seq)
    out = jax.block_until_ready(out)

    assert out.shape == (B, T, C)
    assert bool(jnp.all(jnp.isfinite(out)))

    # tolerance check against the pure-JAX (torch-faithful, f32) reference;
    # bf16 MXU operands + approx reciprocal keep max abs err ~1e-3 here.
    ref = block_forward_ref(x, params, attn_mask, n_head=n_head, max_seq=max_seq)
    err = float(jnp.max(jnp.abs(out - ref)))
    assert err < 2e-2, f"mismatch vs pure-JAX reference: max abs err = {err}"

    print("KERNEL_OK")
</pallas_src>

<mosaic_0001>
module attributes {stable_mosaic.version = 11 : i64} {
  func.func @attn_head_kernel(%arg0: i32, %arg1: i32, %arg2: memref<1x8x32xf32, #tpu.memory_space<vmem>>, %arg3: memref<1x32xf32, #tpu.memory_space<vmem>>, %arg4: memref<1x32xf32, #tpu.memory_space<vmem>>, %arg5: memref<1x32x8xbf16, #tpu.memory_space<vmem>>, %arg6: memref<1x32x8xbf16, #tpu.memory_space<vmem>>, %arg7: memref<1x32x8xbf16, #tpu.memory_space<vmem>>, %arg8: memref<1x1x8xf32, #tpu.memory_space<vmem>>, %arg9: memref<1x1x8xf32, #tpu.memory_space<vmem>>, %arg10: memref<1x1x8xf32, #tpu.memory_space<vmem>>, %arg11: memref<128x8xbf16, #tpu.memory_space<vmem>>, %arg12: memref<8x8xf32, #tpu.memory_space<vmem>>, %arg13: memref<1x1x8x8xf32, #tpu.memory_space<vmem>>, %arg14: memref<8x32xf32, #tpu.memory_space<vmem>>) attributes {dimension_semantics = [#tpu.dimension_semantics<parallel>, #tpu.dimension_semantics<arbitrary>], iteration_bounds = array<i64: 2, 4>, scalar_prefetch = 0 : i64, scratch_operands = 1 : i64, tpu.core_type = #tpu.core_type<tc>, window_params = [{transform_indices = @transform_0, window_bounds = array<i64: 1, 8, 32>}, {pipeline_mode = #tpu.pipeline_mode<synchronous>, transform_indices = @transform_1, window_bounds = array<i64: 1, 32>}, {pipeline_mode = #tpu.pipeline_mode<synchronous>, transform_indices = @transform_2, window_bounds = array<i64: 1, 32>}, {transform_indices = @transform_3, window_bounds = array<i64: 1, 32, 8>}, {transform_indices = @transform_4, window_bounds = array<i64: 1, 32, 8>}, {transform_indices = @transform_5, window_bounds = array<i64: 1, 32, 8>}, {transform_indices = @transform_6, window_bounds = array<i64: 1, 1, 8>}, {transform_indices = @transform_7, window_bounds = array<i64: 1, 1, 8>}, {transform_indices = @transform_8, window_bounds = array<i64: 1, 1, 8>}, {pipeline_mode = #tpu.pipeline_mode<synchronous>, transform_indices = @transform_9, window_bounds = array<i64: 128, 8>}, {pipeline_mode = #tpu.pipeline_mode<synchronous>, transform_indices = @transform_10, window_bounds = array<i64: 8, 8>}, {transform_indices = @transform_11, window_bounds = array<i64: 1, 1, 8, 8>}]} {
    %c0_i32 = arith.constant 0 : i32
    %0 = arith.cmpi eq, %arg1, %c0_i32 : i32
    %1 = arith.extui %0 : i1 to i32
    %c0_i32_0 = arith.constant 0 : i32
    %2 = arith.cmpi ne, %1, %c0_i32_0 : i32
    scf.if %2 {
      %c0_36 = arith.constant 0 : index
      %c0_37 = arith.constant 0 : index
      %c0_38 = arith.constant 0 : index
      %54 = vector.load %arg2[%c0_36, %c0_37, %c0_38] : memref<1x8x32xf32, #tpu.memory_space<vmem>>, vector<1x8x32xf32>
      %55 = vector.shape_cast %54 : vector<1x8x32xf32> to vector<8x32xf32>
      %c0_39 = arith.constant 0 : index
      %c0_40 = arith.constant 0 : index
      %56 = vector.load %arg3[%c0_39, %c0_40] : memref<1x32xf32, #tpu.memory_space<vmem>>, vector<1x32xf32>
      %c0_41 = arith.constant 0 : index
      %c0_42 = arith.constant 0 : index
      %57 = vector.load %arg4[%c0_41, %c0_42] : memref<1x32xf32, #tpu.memory_space<vmem>>, vector<1x32xf32>
      %cst_43 = arith.constant dense<0.000000e+00> : vector<8xf32>
      %58 = vector.multi_reduction <add>, %55, %cst_43 [1] : vector<8x32xf32> to vector<8xf32>
      %59 = vector.shape_cast %58 : vector<8xf32> to vector<8x1xf32>
      %cst_44 = arith.constant 3.200000e+01 : f32
      %60 = vector.broadcast %cst_44 : f32 to vector<8x1xf32>
      %61 = arith.divf %59, %60 : vector<8x1xf32>
      %62 = vector.broadcast %61 : vector<8x1xf32> to vector<8x32xf32>
      %63 = arith.subf %55, %62 : vector<8x32xf32>
      %64 = arith.mulf %63, %63 : vector<8x32xf32>
      %cst_45 = arith.constant dense<0.000000e+00> : vector<8xf32>
      %65 = vector.multi_reduction <add>, %64, %cst_45 [1] : vector<8x32xf32> to vector<8xf32>
      %66 = vector.shape_cast %65 : vector<8xf32> to vector<8x1xf32>
      %cst_46 = arith.constant 3.200000e+01 : f32
      %67 = vector.broadcast %cst_46 : f32 to vector<8x1xf32>
      %68 = arith.divf %66, %67 : vector<8x1xf32>
      %cst_47 = arith.constant 9.99999974E-6 : f32
      %69 = vector.broadcast %cst_47 : f32 to vector<8x1xf32>
      %70 = arith.addf %68, %69 : vector<8x1xf32>
      %71 = math.rsqrt %70 : vector<8x1xf32>
      %72 = vector.broadcast %71 : vector<8x1xf32> to vector<8x32xf32>
      %73 = arith.mulf %63, %72 : vector<8x32xf32>
      %74 = vector.broadcast %56 : vector<1x32xf32> to vector<8x32xf32>
      %75 = arith.mulf %73, %74 : vector<8x32xf32>
      %76 = vector.broadcast %57 : vector<1x32xf32> to vector<8x32xf32>
      %77 = arith.addf %75, %76 : vector<8x32xf32>
      %c0_48 = arith.constant 0 : index
      %c0_49 = arith.constant 0 : index
      %78 = vector.load %arg14[%c0_48, %c0_49] : memref<8x32xf32, #tpu.memory_space<vmem>>, vector<8x32xf32>
      tpu.vector_store %arg14[%c0_48, %c0_49], %77 {strides = array<i32>} : memref<8x32xf32, #tpu.memory_space<vmem>>, vector<8x32xf32>,
    } else {
    }
    %c0 = arith.constant 0 : index
    %c0_1 = arith.constant 0 : index
    %3 = vector.load %arg14[%c0, %c0_1] : memref<8x32xf32, #tpu.memory_space<vmem>>, vector<8x32xf32>
    %4 = arith.truncf %3 : vector<8x32xf32> to vector<8x32xbf16>
    %c0_2 = arith.constant 0 : index
    %c0_3 = arith.constant 0 : index
    %c0_4 = arith.constant 0 : index
    %5 = vector.load %arg5[%c0_2, %c0_3, %c0_4] : memref<1x32x8xbf16, #tpu.memory_space<vmem>>, vector<1x32x8xbf16>
    %6 = vector.shape_cast %5 : vector<1x32x8xbf16> to vector<32x8xbf16>
    %cst = arith.constant dense<0.000000e+00> : vector<8x8xf32>
    %7 = tpu.matmul %4, %6, %cst {dimension_numbers = #tpu.dot_dimension_numbers<[1], [0], [0], [1], [0, 0, 1, 1], [], []>} : vector<8x32xbf16>, vector<32x8xbf16>, vector<8x8xf32> -> vector<8x8xf32>
    %c0_5 = arith.constant 0 : index
    %c0_6 = arith.constant 0 : index
    %c0_7 = arith.constant 0 : index
    %8 = vector.load %arg8[%c0_5, %c0_6, %c0_7] : memref<1x1x8xf32, #tpu.memory_space<vmem>>, vector<1x1x8xf32>
    %9 = vector.shape_cast %8 : vector<1x1x8xf32> to vector<1x8xf32>
    %10 = vector.broadcast %9 : vector<1x8xf32> to vector<8x8xf32>
    %11 = arith.addf %7, %10 : vector<8x8xf32>
    %c0_8 = arith.constant 0 : index
    %c0_9 = arith.constant 0 : index
    %c0_10 = arith.constant 0 : index
    %12 = vector.load %arg6[%c0_8, %c0_9, %c0_10] : memref<1x32x8xbf16, #tpu.memory_space<vmem>>, vector<1x32x8xbf16>
    %13 = vector.shape_cast %12 : vector<1x32x8xbf16> to vector<32x8xbf16>
    %cst_11 = arith.constant dense<0.000000e+00> : vector<8x8xf32>
    %14 = tpu.matmul %4, %13, %cst_11 {dimension_numbers = #tpu.dot_dimension_numbers<[1], [0], [0], [1], [0, 0, 1, 1], [], []>} : vector<8x32xbf16>, vector<32x8xbf16>, vector<8x8xf32> -> vector<8x8xf32>
    %c0_12 = arith.constant 0 : index
    %c0_13 = arith.constant 0 : index
    %c0_14 = arith.constant 0 : index
    %15 = vector.load %arg9[%c0_12, %c0_13, %c0_14] : memref<1x1x8xf32, #tpu.memory_space<vmem>>, vector<1x1x8xf32>
    %16 = vector.shape_cast %15 : vector<1x1x8xf32> to vector<1x8xf32>
    %17 = vector.broadcast %16 : vector<1x8xf32> to vector<8x8xf32>
    %18 = arith.addf %14, %17 : vector<8x8xf32>
    %c0_15 = arith.constant 0 : index
    %c0_16 = arith.constant 0 : index
    %c0_17 = arith.constant 0 : index
    %19 = vector.load %arg7[%c0_15, %c0_16, %c0_17] : memref<1x32x8xbf16, #tpu.memory_space<vmem>>, vector<1x32x8xbf16>
    %20 = vector.shape_cast %19 : vector<1x32x8xbf16> to vector<32x8xbf16>
    %cst_18 = arith.constant dense<0.000000e+00> : vector<8x8xf32>
    %21 = tpu.matmul %4, %20, %cst_18 {dimension_numbers = #tpu.dot_dimension_numbers<[1], [0], [0], [1], [0, 0, 1, 1], [], []>} : vector<8x32xbf16>, vector<32x8xbf16>, vector<8x8xf32> -> vector<8x8xf32>
    %c0_19 = arith.constant 0 : index
    %c0_20 = arith.constant 0 : index
    %c0_21 = arith.constant 0 : index
    %22 = vector.load %arg10[%c0_19, %c0_20, %c0_21] : memref<1x1x8xf32, #tpu.memory_space<vmem>>, vector<1x1x8xf32>
    %23 = vector.shape_cast %22 : vector<1x1x8xf32> to vector<1x8xf32>
    %24 = vector.broadcast %23 : vector<1x8xf32> to vector<8x8xf32>
    %25 = arith.addf %21, %24 : vector<8x8xf32>
    %26 = arith.truncf %11 : vector<8x8xf32> to vector<8x8xbf16>
    %27 = arith.truncf %18 : vector<8x8xf32> to vector<8x8xbf16>
    %cst_22 = arith.constant dense<0.000000e+00> : vector<8x8xf32>
    %28 = tpu.matmul %26, %27, %cst_22 {dimension_numbers = #tpu.dot_dimension_numbers<[1], [1], [0], [0], [0, 0, 1, 0], [], []>} : vector<8x8xbf16>, vector<8x8xbf16>, vector<8x8xf32> -> vector<8x8xf32>
    %c0_23 = arith.constant 0 : index
    %c0_24 = arith.constant 0 : index
    %29 = vector.load %arg11[%c0_23, %c0_24] : memref<128x8xbf16, #tpu.memory_space<vmem>>, vector<128x8xbf16>
    %cst_25 = arith.constant dense<0.000000e+00> : vector<8x128xf32>
    %30 = tpu.matmul %26, %29, %cst_25 {dimension_numbers = #tpu.dot_dimension_numbers<[1], [1], [0], [0], [0, 0, 1, 0], [], []>} : vector<8x8xbf16>, vector<128x8xbf16>, vector<8x128xf32> -> vector<8x128xf32>
    %c1_i32 = arith.constant 1 : i32
    %31 = tpu.dynamic_rotate %30 by %c1_i32 dim 1 {stride = 1 : si32, stride_dimension = 0 : si32} : vector<8x128xf32>, i32 -> vector<8x128xf32>
    %32 = vector.extract_strided_slice %31 {offsets = [0, 0], sizes = [8, 8], strides = [1, 1]} : vector<8x128xf32> to vector<8x8xf32>
    %33 = arith.addf %28, %32 : vector<8x8xf32>
    %cst_26 = arith.constant 0.353553385 : f32
    %34 = vector.broadcast %cst_26 : f32 to vector<8x8xf32>
    %35 = arith.mulf %33, %34 : vector<8x8xf32>
    %c0_27 = arith.constant 0 : index
    %c0_28 = arith.constant 0 : index
    %36 = vector.load %arg12[%c0_27, %c0_28] : memref<8x8xf32, #tpu.memory_space<vmem>>, vector<8x8xf32>
    %37 = arith.addf %35, %36 : vector<8x8xf32>
    %cst_29 = arith.constant dense<0xFF800000> : vector<8xf32>
    %38 = vector.multi_reduction <maximumf>, %37, %cst_29 [1] : vector<8x8xf32> to vector<8xf32>
    %39 = vector.shape_cast %38 : vector<8xf32> to vector<8x1xf32>
    %40 = vector.broadcast %39 : vector<8x1xf32> to vector<8x8xf32>
    %41 = arith.subf %37, %40 : vector<8x8xf32>
    %42 = math.exp %41 : vector<8x8xf32>
    %cst_30 = arith.constant dense<0.000000e+00> : vector<8xf32>
    %43 = vector.multi_reduction <add>, %42, %cst_30 [1] : vector<8x8xf32> to vector<8xf32>
    %44 = vector.shape_cast %43 : vector<8xf32> to vector<8x1xf32>
    %45 = tpu.reciprocal %44 {approx = true} : vector<8x1xf32> -> vector<8x1xf32>
    %46 = vector.broadcast %45 : vector<8x1xf32> to vector<8x8xf32>
    %47 = arith.mulf %42, %46 : vector<8x8xf32>
    %48 = arith.truncf %47 : vector<8x8xf32> to vector<8x8xbf16>
    %49 = arith.truncf %25 : vector<8x8xf32> to vector<8x8xbf16>
    %cst_31 = arith.constant dense<0.000000e+00> : vector<8x8xf32>
    %50 = tpu.matmul %48, %49, %cst_31 {dimension_numbers = #tpu.dot_dimension_numbers<[1], [0], [0], [1], [0, 0, 1, 1], [], []>} : vector<8x8xbf16>, vector<8x8xbf16>, vector<8x8xf32> -> vector<8x8xf32>
    %c0_32 = arith.constant 0 : index
    %c0_33 = arith.constant 0 : index
    %c0_34 = arith.constant 0 : index
    %c0_35 = arith.constant 0 : index
    %51 = vector.load %arg13[%c0_32, %c0_33, %c0_34, %c0_35] : memref<1x1x8x8xf32, #tpu.memory_space<vmem>>, vector<1x1x8x8xf32>
    %52 = vector.shape_cast %51 : vector<1x1x8x8xf32> to vector<8x8xf32>
    %53 = vector.shape_cast %50 : vector<8x8xf32> to vector<1x1x8x8xf32>
    tpu.vector_store %arg13[%c0_32, %c0_33, %c0_34, %c0_35], %53 {strides = array<i32>} : memref<1x1x8x8xf32, #tpu.memory_space<vmem>>, vector<1x1x8x8xf32>,
    return
  }
  func.func @transform_0(%arg0: i32, %arg1: i32) -> (i32, i32, i32) {
    %c0_i32 = arith.constant 0 : i32
    %c0_i32_0 = arith.constant 0 : i32
    %c0_i32_1 = arith.constant 0 : i32
    return %arg0, %c0_i32, %c0_i32_0 : i32, i32, i32
  }
  func.func @transform_1(%arg0: i32, %arg1: i32) -> (i32, i32) {
    %c0_i32 = arith.constant 0 : i32
    %c0_i32_0 = arith.constant 0 : i32
    %c0_i32_1 = arith.constant 0 : i32
    return %c0_i32, %c0_i32_0 : i32, i32
  }
  func.func @transform_2(%arg0: i32, %arg1: i32) -> (i32, i32) {
    %c0_i32 = arith.constant 0 : i32
    %c0_i32_0 = arith.constant 0 : i32
    %c0_i32_1 = arith.constant 0 : i32
    return %c0_i32, %c0_i32_0 : i32, i32
  }
  func.func @transform_3(%arg0: i32, %arg1: i32) -> (i32, i32, i32) {
    %c0_i32 = arith.constant 0 : i32
    %c0_i32_0 = arith.constant 0 : i32
    %c0_i32_1 = arith.constant 0 : i32
    return %arg1, %c0_i32, %c0_i32_0 : i32, i32, i32
  }
  func.func @transform_4(%arg0: i32, %arg1: i32) -> (i32, i32, i32) {
    %c0_i32 = arith.constant 0 : i32
    %c0_i32_0 = arith.constant 0 : i32
    %c0_i32_1 = arith.constant 0 : i32
    return %arg1, %c0_i32, %c0_i32_0 : i32, i32, i32
  }
  func.func @transform_5(%arg0: i32, %arg1: i32) -> (i32, i32, i32) {
    %c0_i32 = arith.constant 0 : i32
    %c0_i32_0 = arith.constant 0 : i32
    %c0_i32_1 = arith.constant 0 : i32
    return %arg1, %c0_i32, %c0_i32_0 : i32, i32, i32
  }
  func.func @transform_6(%arg0: i32, %arg1: i32) -> (i32, i32, i32) {
    %c0_i32 = arith.constant 0 : i32
    %c0_i32_0 = arith.constant 0 : i32
    %c0_i32_1 = arith.constant 0 : i32
    return %arg1, %c0_i32, %c0_i32_0 : i32, i32, i32
  }
  func.func @transform_7(%arg0: i32, %arg1: i32) -> (i32, i32, i32) {
    %c0_i32 = arith.constant 0 : i32
    %c0_i32_0 = arith.constant 0 : i32
    %c0_i32_1 = arith.constant 0 : i32
    return %arg1, %c0_i32, %c0_i32_0 : i32, i32, i32
  }
  func.func @transform_8(%arg0: i32, %arg1: i32) -> (i32, i32, i32) {
    %c0_i32 = arith.constant 0 : i32
    %c0_i32_0 = arith.constant 0 : i32
    %c0_i32_1 = arith.constant 0 : i32
    return %arg1, %c0_i32, %c0_i32_0 : i32, i32, i32
  }
  func.func @transform_9(%arg0: i32, %arg1: i32) -> (i32, i32) {
    %c0_i32 = arith.constant 0 : i32
    %c0_i32_0 = arith.constant 0 : i32
    %c0_i32_1 = arith.constant 0 : i32
    return %c0_i32, %c0_i32_0 : i32, i32
  }
  func.func @transform_10(%arg0: i32, %arg1: i32) -> (i32, i32) {
    %c0_i32 = arith.constant 0 : i32
    %c0_i32_0 = arith.constant 0 : i32
    %c0_i32_1 = arith.constant 0 : i32
    return %c0_i32, %c0_i32_0 : i32, i32
  }
  func.func @transform_11(%arg0: i32, %arg1: i32) -> (i32, i32, i32, i32) {
    %c0_i32 = arith.constant 0 : i32
    %c0_i32_0 = arith.constant 0 : i32
    %c0_i32_1 = arith.constant 0 : i32
    return %arg0, %arg1, %c0_i32, %c0_i32_0 : i32, i32, i32, i32
  }
}

</mosaic_0001>

<bundles_post_ra>
// kernel: tpu_custom_call.1
= control target key start
LH: loop header
LB: loop body
LE: loop exit
PB: predicated region body
PF: predicated region fallthrough
CT: control target
= control target key end

     0   :  { %s1780_s0 = inlined_call_operand.vmem [shape: f32[2,8,32], index: 0, kind: input, shape index: {}]   ;;  %s1781_s1 = inlined_call_operand.vmem [shape: f32[1,32], index: 1, kind: input, shape index: {}]   ;;  %s1782_s2 = inlined_call_operand.vmem [shape: f32[1,32], index: 2, kind: input, shape index: {}]   ;;  %s1783_s3 = inlined_call_operand.vmem [shape: bf16[4,32,8], index: 3, kind: input, shape index: {}]   ;;  %s1784_s4 = inlined_call_operand.vmem [shape: bf16[4,32,8], index: 4, kind: input, shape index: {}]   ;;  %s1785_s5 = inlined_call_operand.vmem [shape: bf16[4,32,8], index: 5, kind: input, shape index: {}]   ;;  %s1786_s6 = inlined_call_operand.vmem [shape: f32[4,1,8], index: 6, kind: input, shape index: {}]   ;;  %s1787_s7 = inlined_call_operand.vmem [shape: f32[4,1,8], index: 7, kind: input, shape index: {}]   ;;  %s1788_s8 = inlined_call_operand.vmem [shape: f32[4,1,8], index: 8, kind: input, shape index: {}]   ;;  %s1789_s9 = inlined_call_operand.vmem [shape: bf16[128,8], index: 9, kind: input, shape index: {}]   ;;  %s1790_s10 = inlined_call_operand.vmem [shape: f32[8,8], index: 10, kind: input, shape index: {}]   ;;  %s1791_s11 = inlined_call_operand.hbm [shape: f32[2,4,8,8], index: 11, kind: output, shape index: {}]  }
   0x1   :  { %1806 = sst [smem:[#allocation17_spill]] %s1780_s0 }
   0x2   :  { %1807 = sst [smem:[#allocation18_spill]] %s1783_s3 }
   0x3   :  { %1808 = sst [smem:[#allocation19_spill]] %s1791_s11 }
   0x4   :  { %16 = vsyncpa [#allocation4], 0 }
   0x5   :  { %18 = vsyncpa [#allocation4 + $0x1], 0  ;;  %s1498_s17 = smov 0   ;;  %s1500_s18 = smov 0  }
   0x6   :  { %s1502_s19 = smov 0   ;;  %s1504_s20 = smov 0  }
   0x7   :  { %s1506_s21 = smov 0   ;;  %s1508_s22 = smov 0  }
   0x8   :  { %s1510_s23 = smov 0   ;;  %s1512_s24 = smov 0  }
   0x9 LB: > { %1809 = sst [smem:[#allocation6_spill]] %s1404_s17  ;;  %s1119_s25 = sadd.s32 4294967295, %s1432_s24   ;;  %s1432_s24 = sphi %s1512_s24, %s24_s24   ;;  %s1428_s23 = sphi %s1510_s23, %s1837_s23   ;;  %s1424_s22 = sphi %s1508_s22, %s1836_s22   ;;  %s1420_s21 = sphi %s1506_s21, %s1835_s21   ;;  %s1416_s20 = sphi %s1504_s20, %s1834_s20   ;;  %s1412_s19 = sphi %s1502_s19, %s1833_s19   ;;  %s1408_s18 = sphi %s1500_s18, %s1832_s18   ;;  %s1404_s17 = sphi %s1498_s17, %s1831_s17  }
   0xa   : > { %1810 = sst [smem:[#allocation7_spill]] %s1408_s18  ;;  %s1120_s26 = sadd.s32 4294967294, %s1432_s24  }
   0xb   : > { %1811 = sst [smem:[#allocation8_spill]] %s1412_s19  ;;  %s33_s27 = sadd.s32 1, %s1424_s22 }
   0xc   : > { %1812 = sst [smem:[#allocation9_spill]] %s1424_s22  ;;  %p34_p0 = scmp.ge.s32.totalorder %s33_s27, 4 }
   0xd   : > { %1813 = sst [smem:[#allocation10_spill]] %s1428_s23  ;;  %s36_s28 = sadd.s32 1, %s1428_s23 }
   0xe   : > { %1814 = sst [smem:[#allocation11_spill]] %s1432_s24  ;;  %p321_p1 = scmp.ne.s32.totalorder %s1412_s19, %s1408_s18 }
   0xf   : > { %p322_p2 = scmp.eq.s32.totalorder %s1119_s25, 7  ;;  %s1839_s27 = smov (%p34_p0, %s33_s27), 0 }
  0x10   : > { %1815 = sst [smem:[#allocation12_spill]] %s1839_s27  ;;  %s1841_s28 = smov (!%p34_p0, %s36_s28), %s1428_s23 }
  0x11   : > { %s307_s29 = ssub.s32 %s1424_s22, %s1839_s27  ;;  %p1549_p3 = por %p322_p2, %p321_p1 }
  0x12   : > { %p38_p4 = scmp.ge.s32.totalorder %s1841_s28, 2  ;;  %p327_p5 = scmp.ne.s32.totalorder %s1408_s18, %s1404_s17 }
  0x13   : > { %s1816_s30 = scalar_select %p1549_p3, 1, 0 }
  0x14   : > { %p328_p6 = scmp.eq.s32.totalorder %s1120_s26, 7  ;;  %p1123_p7 = scmp.ge.s32.totalorder %s1432_s24, 1 }
  0x15   : > { %1817 = sst [smem:[#allocation13_spill]] %s1816_s30  ;;  %s1843_s28 = smov (%p38_p4, %s1841_s28), 0 }
  0x16   : > { %1818 = sst [smem:[#allocation14_spill]] %s1843_s28  ;;  %p1558_p8 = por %p328_p6, %p327_p5 }
  0x17   : > { %p407_p9 = scmp.lt.s32.totalorder %s1432_s24, 9  ;;  %s306_s13 = ssub.s32 %s1428_s23, %s1843_s28 }
  0x18   : > { %s1819_s12 = scalar_select %p1558_p8, 1, 0 }
  0x19   : > { %s311_s14 = sadd.s32 1, %s1412_s19  ;;  %s308_s15 = sor.u32 %s307_s29, %s306_s13 }
  0x1a   : > { %1820 = sst [smem:[#allocation15_spill]] %s1819_s12  ;;  %p408_p10 = pnand %p1123_p7, %p407_p9 }
  0x1b   : > { %p309_p11 = scmp.eq.s32.totalorder %s308_s15, 0  ;;  %s1796_s25 = sand.u32 (!%p408_p10), 1, %s1408_s18  }
  0x1c   : > { %411 = sbr.rel (%p408_p10) target bundleno = 1455 (0x5af), region = 64  ;;  %p470_p12 = scmp.lt.s32.totalorder (!%p408_p10), %s1420_s21, 1 }
  0x1d   : > { %s1567_s16 = scalar_select %p309_p11, %s1412_s19, %s311_s14  }
  0x1e   : > { %s1573_s26 = sshll.u32 (!%p408_p10), %s1796_s25, 3  ;;  %p474_p13 = scmp.lt.s32.totalorder (!%p408_p10), %s1416_s20, 3 }
  0x1f   : > { %1821 = sst [smem:[#allocation16_spill]] %s1567_s16  ;;  %s1822_s0 = sld [smem:[#allocation17_spill]] (!%p408_p10) }
  0x20   : > { %s1823_s3 = sld [smem:[#allocation18_spill]] (!%p408_p10)  ;;  %s469_s19 = scalar_lea.vmem (!%p408_p10), [#allocation3], %s1573_s26 }
  0x21   : > { %p1132_p0 = scmp.ne.s32.totalorder (!%p408_p10), %s1416_s20, 0 }
  0x23   : > { %s471_s28 = scalar_select %p470_p12, %s1420_s21, 1 }
  0x24   : > { %s1578_s29 = scalar_select %p474_p13, %s1416_s20, 3 }
  0x25   : > { %s1125_s13 = sshll.u32 %s471_s28, 3  ;;  %502 = sbr.rel (%p1132_p0) target bundleno = 354 (0x162), region = 68  ;;  %vm506_vm0 = vcmask (!%p1132_p0), 261120   ;;  %v1133_v11 = vld [vmem:[%s1781_s1] ss:$0 sm:$0xff] (!%p1132_p0) }
  0x26   : > { %s473_s27 = scalar_lea.vmem %s1822_s0, %s1125_s13  ;;  %s1163_s23 = sshll.u32 %s1578_s29, 4  ;;  %v1134_v13 = vld [vmem:[%s1782_s2] ss:$0 sm:$0xff] (!%p1132_p0) }
  0x27   : > { %s1587_s25 = scalar_lea.vmem %s1823_s3, %s1163_s23  ;;  %s1592_s17 = scalar_lea.vmem %s1784_s4, %s1163_s23  ;;  %v503_v0 = vld [vmem:[%s473_s27] sm:$0xff] (!%p1132_p0) }
  0x28   : > { %s1597_s30 = scalar_lea.vmem %s1785_s5, %s1163_s23  ;;  %s491_s13 = scalar_lea.vmem %s1786_s6, %s1578_s29  ;;  %v507_v1 = vsel (!%p1132_p0), %vm506_vm0, %v503_v0, 0.0 }
  0x29   : > { %s494_s22 = scalar_lea.vmem %s1787_s7, %s1578_s29  ;;  %s497_s3 = scalar_lea.vmem %s1788_s8, %s1578_s29  ;;  %508 = vadd.xlane.f32.xlu0 (!%p1132_p0), %v507_v1 }
  0xb6   : > { %v509_v2 = vpop.xlane.xlu0 %508 }
  0xb7   : > { %v511_v3 = vmul.f32 0.03125, %v509_v2 }
  0xb9   : > { %v512_v4 = vsub.f32 %v503_v0, %v511_v3 }
  0xbb   : > { %v513_v5 = vmul.f32 %v512_v4, %v512_v4 }
  0xbd   : > { %v514_v6 = vsel %vm506_vm0, %v513_v5, 0.0 }
  0xbe   : > { %515 = vadd.xlane.f32.xlu0 %v514_v6 }
 0x14b   : > { %v516_v7 = vpop.xlane.xlu0 %515 }
 0x14c   : > { %v517_v8 = vmul.f32 0.03125, %v516_v7 }
 0x14e   : > { %v518_v9 = vadd.f32 1e-05, %v517_v8 }
 0x150   : > { %1318 = vrsqrt.f32 %v518_v9 }
 0x15a   : > { %v1319_v10 = vpop.eup %1318 }
 0x15b   : > { %v520_v12 = vmul.f32 %v1319_v10, %v512_v4 }
 0x15d   : > { %v527_v14 = vmul.f32 %v1133_v11, %v520_v12 }
 0x15f   : > { %v534_v15 = vadd.f32 %v1134_v13, %v527_v14 }
 0x161   : > { %535 = vst.msk [vmem:[#allocation2] sm:$0xff] %vm506_vm0, %v534_v15 }
 0x162 PF: > { %v1320_v16 = vld [vmem:[%s1587_s25] sm:$0xff]   ;;  %v1434_v17 = vmov 0.0   ;;  %v1321_v18 = vld [vmem:[%s1587_s25 + $0x8] sm:$0xff]   ;;  %vm1435_vm1 = vmmov 0   ;;  %vm789_vm2 = vcmask 64512   ;;  %vm561_vm3 = vcmask 261120  }
 0x163   : > { %1188 = vmatprep.subr.bf16.mxu0 %v1434_v17  ;;  %1212 = vmatprep.subr.bf16.mxu1 %v1434_v17  ;;  %v1324_v21 = vld [vmem:[%s1789_s9] sm:$0xff]   ;;  %v1325_v24 = vld [vmem:[%s1789_s9 + $0x8] sm:$0xff]   ;;  %v1326_v27 = vld [vmem:[%s1789_s9 + $0x10] sm:$0xff]   ;;  %vm923_vm4 = vcmask 1043456   ;;  %s1824_s15 = sld [smem:[#allocation7_spill]]  ;;  %s1159_s0 = sshll.u32 %s1420_s21, 2 }
 0x164   : > { %1189 = vmatpush3.bf16.msra.mxu0 %v1320_v16  ;;  %1192 = vmatprep.mubr.msk.bf16.mxu0 %vm1435_vm1, %v1434_v17  ;;  %v1322_v22 = vld [vmem:[%s1592_s17] sm:$0xff]   ;;  %v794_v23 = vsel %vm789_vm2, %v1324_v21, 0  ;;  %v1323_v25 = vld [vmem:[%s1592_s17 + $0x8] sm:$0xff]   ;;  %v797_v26 = vsel %vm789_vm2, %v1325_v24, 0  ;;  %v800_v28 = vsel %vm789_vm2, %v1326_v27, 0  ;;  %v1327_v29 = vld [vmem:[%s1789_s9 + $0x18] sm:$0xff]   ;;  %s980_s11 = sadd.s32 %s1416_s20, %s1159_s0 }
 0x165   : > { %1190 = vmatprep.subr.bf16.mxu0 %v1434_v17  ;;  %1228 = vmatprep.mubr.msk.bf16.mxu1 %vm1435_vm1, %v1434_v17  ;;  %v803_v30 = vsel %vm789_vm2, %v1327_v29, 0  ;;  %v1328_v31 = vld [vmem:[%s1789_s9 + $0x20] sm:$0xff]   ;;  %v1329_v33 = vld [vmem:[%s1789_s9 + $0x28] sm:$0xff]   ;;  %v1330_v35 = vld [vmem:[%s1789_s9 + $0x30] sm:$0xff]   ;;  %s1160_s18 = sshll.u32 %s980_s11, 7  ;;  %s984_s23 = sshll.u32 %s469_s19, 4  ;;  %s1724_s23 = int_to_ptr.vmem [resolvable:$true] %s984_s23 }
 0x166   : > { %1213 = vmatpush3.bf16.xpose.msra.mxu1 %v794_v23  ;;  %v806_v32 = vsel %vm789_vm2, %v1328_v31, 0  ;;  %v809_v34 = vsel %vm789_vm2, %v1329_v33, 0  ;;  %v812_v36 = vsel %vm789_vm2, %v1330_v35, 0  ;;  %v1331_v37 = vld [vmem:[%s1789_s9 + $0x38] sm:$0xff]   ;;  %v1332_v39 = vld [vmem:[%s1597_s30] sm:$0xff]   ;;  %v1333_v40 = vld [vmem:[%s1597_s30 + $0x8] sm:$0xff]  }
 0x167   : > { %1214 = vmatprep.subr.bf16.mxu1 %v1434_v17  ;;  %v815_v38 = vsel %vm789_vm2, %v1331_v37, 0  ;;  %v1135_v41 = vld [vmem:[%s491_s13] ss:$0 sm:$0xff]  ;;  %s1826_s12 = sld [smem:[#allocation19_spill]]  ;;  %s1338_s28 = scalar_lea.vmem %s1724_s23, 128 }
 0x168   : > { %v536_v19 = vld [vmem:[#allocation2] sm:$0xff]  ;;  %1191 = vmatpush3.bf16.msra.mxu0 %v1321_v18  ;;  %p1339_p1 = scmp.ne.s32.totalorder %s1724_s23, %s1338_s28  ;;  %s1437_s30 = smov [#allocation3]  }
 0x169   : > { %v537_v20 = vpack.c.bf16 %v536_v19, %v536_v19  ;;  %1196 = vmatprep.subr.bf16.mxu0 %v1434_v17  ;;  %v1139_v48 = vld [vmem:[%s494_s22] ss:$0 sm:$0xff]  ;;  %s1436_s22 = smov 257   ;;  %s1827_s20 = sand.u32 1, %s1824_s15  }
 0x16a   : > { %v1143_v56 = vld [vmem:[%s497_s3] ss:$0 sm:$0xff]  ;;  %s969_s21 = scalar_lea.sflag [#allocation4], %s1827_s20  ;;  %p1340_p2 = pnand %p1339_p1, %p1549_p3 }
 0x16b   : > { %1193 = vmatmul.mubr.msk.bf16.vlgmr.msra.gmra.mrb[0].mxu0 %vm561_vm3, %v537_v20  ;;  %v905_v10 = vld [vmem:[%s1790_s10] sm:$0xff]  ;;  %s1342_s14 = sshll.u32 %s1437_s30, 4  ;;  %s1343_s14 = int_to_ptr.vmem [resolvable:$false] %s1342_s14 }
 0x16c   : > { %1197 = vmatpush3.bf16.msra.mxu0 %v1322_v22  ;;  %1200 = vmatprep.mubr.msk.bf16.mxu0 %vm1435_vm1, %v1434_v17  ;;  %p1341_p4 = pneg %p1340_p2  ;;  %s1344_s13 = scalar_lea.vmem %s1343_s14, 256 }
 0x16d   : > { %1198 = vmatprep.subr.bf16.mxu0 %v1434_v17  ;;  %s1722_s25 = scalar_lea.hbm %s1826_s12, %s1160_s18  ;;  %p1345_p5 = scmp.lt.s32.totalorder %s1724_s23, %s1343_s14 }
 0x16e   : > { %1215 = vmatpush3.bf16.xpose.msra.mxu1 %v797_v26  ;;  %p1346_p6 = scmp.lt.s32.totalorder %s1344_s13, %s1338_s28 }
 0x16f   : > { %1216 = vmatprep.subr.bf16.mxu1 %v1434_v17 }
 0x170   : > { %1199 = vmatpush3.bf16.msra.mxu0 %v1323_v25  ;;  %p1347_p7 = por %p1346_p6, %p1345_p5 }
 0x171   : > { %1204 = vmatprep.subr.bf16.mxu0 %v1434_v17 }
 0x172   : > { %p1348_p9 = pnand %p1347_p7, %p1341_p4 }
 0x173   : > { %1201 = vmatmul.mubr.msk.bf16.vlgmr.msra.gmra.mrb[4].mxu0 %vm561_vm3, %v537_v20 }
 0x174   : > { %1208 = vmatprep.mubr.msk.bf16.mxu0 %vm1435_vm1, %v1434_v17  ;;  %1205 = vmatpush3.bf16.msra.mxu0 %v1332_v39 }
 0x175   : > { %1206 = vmatprep.subr.bf16.mxu0 %v1434_v17 }
 0x176   : > { %1217 = vmatpush3.bf16.xpose.msra.mxu1 %v800_v28 }
 0x177   : > { %1218 = vmatprep.subr.bf16.mxu1 %v1434_v17 }
 0x178   : > { %1207 = vmatpush3.bf16.msra.mxu0 %v1333_v40 }
 0x179   : > { %1232 = vmatprep.subr.bf16.mxu0 %v1434_v17 }
 0x17b   : > { %1209 = vmatmul.mubr.msk.bf16.vlgmr.msra.gmra.mrb[8].mxu0 %vm561_vm3, %v537_v20 }
 0x17c   : > { %1234 = vmatprep.mubr.msk.bf16.mxu0 %vm1435_vm1, %v1434_v17 }
 0x17e   : > { %1219 = vmatpush3.bf16.xpose.msra.mxu1 %v803_v30 }
 0x17f   : > { %1220 = vmatprep.subr.bf16.mxu1 %v1434_v17 }
 0x186   : > { %1221 = vmatpush3.bf16.xpose.msra.mxu1 %v806_v32 }
 0x187   : > { %1222 = vmatprep.subr.bf16.mxu1 %v1434_v17 }
 0x18e   : > { %1223 = vmatpush3.bf16.xpose.msra.mxu1 %v809_v34 }
 0x18f   : > { %1224 = vmatprep.subr.bf16.mxu1 %v1434_v17 }
 0x196   : > { %1225 = vmatpush3.bf16.xpose.msra.mxu1 %v812_v36 }
 0x197   : > { %1226 = vmatprep.subr.bf16.mxu1 %v1434_v17 }
 0x19e   : > { %1227 = vmatpush3.bf16.xpose.msra.mxu1 %v815_v38 }
 0x23e   : > { %v599_v42 = vpop.f32.mrb[0].mxu0 }
 0x23f   : > { %v600_v43 = vadd.f32 %v1135_v41, %v599_v42  ;;  %v1194_v44 = vpop.f32.mrb[1].mxu0 }
 0x240   : > { %v602_v45 = vpop.f32.mrb[2].mxu0 }
 0x241   : > { %v731_v46 = vpack.c.bf16 %v600_v43, %v600_v43  ;;  %v1195_v47 = vpop.f32.mrb[3].mxu0 }
 0x243   : > { %1229 = vmatmul.mubr.msk.bf16.vlgmr.msra.gmra.mrb[0].mxu1 %vm789_vm2, %v731_v46 }
 0x246   : > { %v662_v49 = vpop.f32.mrb[4].mxu0 }
 0x247   : > { %v663_v50 = vadd.f32 %v1139_v48, %v662_v49  ;;  %v1202_v51 = vpop.f32.mrb[5].mxu0 }
 0x248   : > { %v665_v52 = vpop.f32.mrb[6].mxu0 }
 0x249   : > { %v732_v53 = vpack.c.bf16 %v663_v50, %v663_v50  ;;  %v1203_v54 = vpop.f32.mrb[7].mxu0 }
 0x24b   : > { %v862_v55 = vsel %vm789_vm2, %v732_v53, 0 }
 0x24c   : > { %1233 = vmatpush3.bf16.xpose.msra.mxu0 %v862_v55 }
 0x24d   : > { %1238 = vmatprep.subr.bf16.mxu0 %v1434_v17 }
 0x24e   : > { %v725_v57 = vpop.f32.mrb[8].mxu0 }
 0x24f   : > { %v726_v58 = vadd.f32 %v1143_v56, %v725_v57  ;;  %v1210_v59 = vpop.f32.mrb[9].mxu0 }
 0x250   : > { %v728_v60 = vpop.f32.mrb[10].mxu0 }
 0x251   : > { %v919_v61 = vpack.c.bf16 %v726_v58, %v726_v58  ;;  %v1211_v62 = vpop.f32.mrb[11].mxu0 }
 0x253   : > { %1235 = vmatmul.mubr.msk.bf16.vlgmr.msra.gmra.mrb[12].mxu0 %vm789_vm2, %v731_v46  ;;  %v925_v63 = vsel %vm923_vm4, %v919_v61, 0 }
 0x254   : > { %1240 = vmatprep.mubr.msk.bf16.mxu0 %vm1435_vm1, %v1434_v17  ;;  %1239 = vmatpush3.bf16.msra.mxu0 %v925_v63 }
 0x316   : > { %v851_v0 = vpop.f32.mrb[0].mxu1 }
 0x317   : > { %859 = vrot.lane.b32.xlu0 %v851_v0, %s1436_s22  ;;  %v1230_v1 = vpop.f32.mrb[1].mxu1 }
 0x318   : > { %v854_v2 = vpop.f32.mrb[2].mxu1 }
 0x319   : > { %v1231_v3 = vpop.f32.mrb[3].mxu1 }
 0x326   : > { %v898_v4 = vpop.f32.mrb[12].mxu0 }
 0x327   : > { %v1236_v5 = vpop.f32.mrb[13].mxu0 }
 0x328   : > { %v901_v6 = vpop.f32.mrb[14].mxu0 }
 0x329   : > { %v1237_v7 = vpop.f32.mrb[15].mxu0 }
 0x389   : > { %v860_v8 = vpop.permute.xlu0 %859 }
 0x38a   : > { %v899_v9 = vadd.f32 %v898_v4, %v860_v8 }
 0x38c   : > { %v904_v11 = vmul.f32 0.35355338, %v899_v9 }
 0x38e   : > { %v906_v12 = vadd.f32 %v905_v10, %v904_v11 }
 0x390   : > { %v907_v13 = vsel %vm789_vm2, %v906_v12, -inf }
 0x391   : > { %908 = vmax.xlane.f32.xlu0 %v907_v13 }
 0x41e   : > { %v909_v14 = vpop.xlane.xlu0 %908 }
 0x41f   : > { %v910_v15 = vsub.f32 %v906_v12, %v909_v14 }
 0x421   : > { %v911_v16 = vmul.f32 1.442695, %v910_v15 }
 0x423   : > { %1334 = vpow2.f32 %v911_v16 }
 0x42d   : > { %v1335_v17 = vpop.eup %1334 }
 0x42e   : > { %v913_v18 = vsel %vm789_vm2, %v1335_v17, 0.0 }
 0x42f   : > { %914 = vadd.xlane.f32.xlu1 %v913_v18 }
 0x4bc   : > { %v915_v19 = vpop.xlane.xlu1 %914 }
 0x4bd   : > { %1336 = vrcp.f32 %v915_v19 }
 0x4c7   : > { %v1337_v20 = vpop.eup %1336 }
 0x4c8   : > { %v917_v21 = vmul.f32 %v1337_v20, %v1335_v17 }
 0x4ca   : > { %v918_v22 = vpack.c.bf16 %v917_v21, %v917_v21 }
 0x4cc   : > { %1241 = vmatmul.mubr.msk.bf16.vlgmr.msra.gmra.mrb[16].mxu0 %vm789_vm2, %v918_v22 }
 0x59f   : > { %v961_v23 = vpop.f32.mrb[16].mxu0 }
 0x5a0   : > { %967 = vst.msk [vmem:[%s469_s19] sm:$0xff] %vm789_vm2, %v961_v23  ;;  %v1242_v24 = vpop.f32.mrb[17].mxu0 }
 0x5a1   : > { %v964_v25 = vpop.f32.mrb[18].mxu0 }
 0x5a2   : > { %1351 = shalt.err (!%p1348_p9)
}
 0x5a3   : > { %s1352_s26 = scalar_lea.hbm %s1722_s25, 128  ;;  %s1356_s22 = scalar_lea.hbm %s1826_s12, 1024 }
 0x5a4   : > { %p1353_p10 = scmp.ne.s32.totalorder %s1722_s25, %s1352_s26  ;;  %p1357_p13 = scmp.lt.u32.totalorder %s1722_s25, %s1826_s12 }
 0x5a5   : > { %p1358_p0 = scmp.lt.u32.totalorder %s1356_s22, %s1352_s26  ;;  %p1360_p2 = scmp.lt.u32.totalorder %s1352_s26, %s1722_s25 }
 0x5a6   : > { %p1354_p11 = pnand %p1353_p10, %p1549_p3 }
 0x5a7   : > { %p1359_p1 = por %p1358_p0, %p1357_p13 }
 0x5a8   : > { %p1355_p12 = pneg %p1354_p11 }
 0x5a9   : > { %p1361_p4 = por %p1360_p2, %p1359_p1 }
 0x5ab   : > { %p1362_p5 = pnand %p1361_p4, %p1355_p12 }
 0x5ad   : > { %1365 = shalt.err (!%p1362_p5)
}
 0x5ae   : > { %1244 = dma.vmem_to_hbm [thread:$0]  (%p1549_p3), %s1724_s23, 128, %s1722_s25, %s969_s21   ;;  %v1243_v26 = vpop.f32.mrb[19].mxu0 }
 0x5af PF: > { %s1828_s15 = sld [smem:[#allocation11_spill]]  ;;  %s1829_s0 = sld [smem:[#allocation6_spill]] }
 0x5b5   : > { %p1250_p6 = scmp.ge.s32.totalorder %s1828_s15, 2  ;;  %s996_s18 = sand.u32 1, %s1829_s0  }
 0x5b6   : > { %s997_s24 = scalar_lea.sflag [#allocation4], %s996_s18 }
 0x5b7   : > { %p1247_p7 = pnand %p1250_p6, %p1558_p8 }
 0x5b9   : > { %1399 = dma.done.wait (!%p1247_p7), %s997_s24, 128  }
 0x5ba   : > { %1401 = vsyncadd (!%p1247_p7), %s997_s24, 4294967168  ;;  %s24_s24 = sadd.s32 1, %s1828_s15   ;;  %s1831_s17 = sld [smem:[#allocation7_spill]] }
 0x5bb   : > { %p21_p9 = scmp.ge.s32.totalorder %s24_s24, 10   ;;  %s1832_s18 = sld [smem:[#allocation8_spill]] }
 0x5bc   : > { %s1833_s19 = sld [smem:[#allocation16_spill]]  ;;  %s1834_s20 = sld [smem:[#allocation9_spill]] }
 0x5bd   : > { %s1835_s21 = sld [smem:[#allocation10_spill]]  ;;  %s1836_s22 = sld [smem:[#allocation12_spill]] }
 0x5be   : > { %s1837_s23 = sld [smem:[#allocation14_spill]]  ;;  %23 = sbr.rel (!%p21_p9) target bundleno = 9 (0x9), region = 121 }
 0x5c5   :  { %1002 = vsyncpa [#allocation4], 1 }
 0x5c6   :  { %1004 = vsyncpa [#allocation4 + $0x1], 1 }

</bundles_post_ra>
